<compile_context>
chip_gen: v5e
topology: v5e:2x2
jax: 0.10.0
libtpu: 0.0.40
codegen_flags: <defaults>
</compile_context>

<pallas_src>
import functools

import jax
import jax.numpy as jnp
from jax.experimental import pallas as pl
from jax.experimental.pallas import tpu as pltpu


def _round_up(x, k):
    return -(-x // k) * k


def _tpu_vmem_bytes():
    try:
        info = pltpu.get_tpu_info()
        cap = getattr(info, "vmem_capacity_bytes", None)
        if cap:
            return int(cap)
    except Exception:
        pass
    return 64 * 1024 * 1024  # conservative (v7x per-TC VMEM)


def _pick_block_b(B, N, M, vmem_cap):
    """Largest divisor of B whose per-step footprint fits ~1/3 of VMEM."""
    lane = 128
    per_b = 4 * (_round_up(N + 1, 8) * _round_up(M + 1, lane)   # scores block
                 + _round_up(N, 8) * lane                        # packed ref block
                 + 8 * _round_up(M, lane)                        # packed src block
                 + 4 * _round_up(N, 8) * _round_up(M, lane))     # (Bt,N,M) temporaries
    budget = max(1, vmem_cap // 3)
    bt_max = max(1, min(B, budget // (2 * per_b)))               # 2x: double-buffered inputs
    for bt in range(int(bt_max), 0, -1):
        if B % bt == 0:
            return bt
    return 1


def _fine_matching_kernel(refpk_ref, srcpk_ref, ms_ref, out_ref, *, r2, n, m):
    refpk = refpk_ref[...]                        # (Bt, N, 4): [x, y, z, mask]
    srcpk = srcpk_ref[...]                        # (Bt, 4, M): rows [x, y, z, mask]
    ms = ms_ref[...].astype(jnp.float32)          # (Bt, N+1, M+1), native dtype in HBM

    refm = refpk[:, :, 3:4]                       # (Bt, N, 1) float {0,1}
    srcm = srcpk[:, 3:4, :]                       # (Bt, 1, M) float {0,1}

    # Pairwise squared distances via per-coordinate broadcast differences (VPU).
    # Kept in this form (not the MXU ||x||^2 - 2xy + ||y||^2 expansion) so labels
    # at the r^2 boundary match the reference exactly.
    dx = refpk[:, :, 0:1] - srcpk[:, 0:1, :]
    dy = refpk[:, :, 1:2] - srcpk[:, 1:2, :]
    dz = refpk[:, :, 2:3] - srcpk[:, 2:3, :]
    gt_corr = jnp.where(dx * dx + dy * dy + dz * dz < r2, refm * srcm, 0.0)  # (Bt,N,M)

    row_sum = jnp.sum(gt_corr, axis=2, keepdims=True)     # (Bt, N, 1)
    col_sum = jnp.sum(gt_corr, axis=1, keepdims=True)     # (Bt, 1, M)
    slack_row = jnp.where(row_sum == 0.0, refm, 0.0)      # (Bt, N, 1)
    slack_col = jnp.where(col_sum == 0.0, srcm, 0.0)      # (Bt, 1, M)

    core = ms[:, :n, :m]                          # (Bt, N, M)  scores[:, :-1, :-1]
    lcol = ms[:, :n, m:m + 1]                     # (Bt, N, 1)  scores[:, :-1, -1]
    lrow = ms[:, n:n + 1, :m]                     # (Bt, 1, M)  scores[:, -1, :-1]

    s = (jnp.sum(core * gt_corr)
         + jnp.sum(lcol * slack_row)
         + jnp.sum(lrow * slack_col))
    c = jnp.sum(gt_corr) + jnp.sum(slack_row) + jnp.sum(slack_col)

    out_ref[0, 0] = s
    out_ref[0, 1] = c


def fine_matching_loss(ref_points, src_points, ref_masks, src_masks,
                       matching_scores, transform, positive_radius, block_b=None):
    f32 = jnp.float32
    B, N, _ = ref_points.shape
    M = src_points.shape[1]
    r2 = float(positive_radius) ** 2

    # ---- wrapper-side prep (only the tiny per-point tensors are touched) ----
    R = transform[:3, :3].astype(f32)
    t = transform[:3, 3].astype(f32)
    src_t = src_points.astype(f32) @ R.T + t                   # apply_transform, (B, M, 3)

    ref_pack = jnp.concatenate(
        [ref_points.astype(f32), ref_masks.astype(f32)[..., None]], axis=2)   # (B, N, 4)
    src_pack = jnp.concatenate(
        [jnp.transpose(src_t, (0, 2, 1)), src_masks.astype(f32)[:, None, :]],
        axis=1)                                                               # (B, 4, M)

    # ---- VMEM-aware batch blocking (no padding: Bt divides B) ---------------
    vmem_cap = _tpu_vmem_bytes()
    Bt = int(block_b) if block_b is not None else _pick_block_b(B, N, M, vmem_cap)
    if Bt <= 0 or B % Bt != 0:
        Bt = _pick_block_b(B, N, M, vmem_cap)
    n_blk = B // Bt

    vmem_limit = int(max(32 * 1024 * 1024,
                         min(int(vmem_cap * 0.7), 96 * 1024 * 1024)))

    kernel = functools.partial(_fine_matching_kernel, r2=r2, n=N, m=M)

    partials = pl.pallas_call(
        kernel,
        out_shape=jax.ShapeDtypeStruct((n_blk, 2), jnp.float32),
        grid=(n_blk,),
        in_specs=[
            pl.BlockSpec((Bt, N, 4), lambda i: (i, 0, 0)),
            pl.BlockSpec((Bt, 4, M), lambda i: (i, 0, 0)),
            pl.BlockSpec((Bt, N + 1, M + 1), lambda i: (i, 0, 0)),
        ],
        out_specs=pl.BlockSpec((1, 2), lambda i: (i, 0),
                               memory_space=pltpu.MemorySpace.SMEM),
        compiler_params=pltpu.CompilerParams(
            dimension_semantics=("parallel",),        # independent per-block partials
            vmem_limit_bytes=vmem_limit),
    )(ref_pack, src_pack, matching_scores)

    total_s = jnp.sum(partials[:, 0])
    total_c = jnp.sum(partials[:, 1])
    # NaN if no positive label anywhere (matches torch mean over empty selection).
    return -total_s / total_c


def reference_loss(ref_points, src_points, ref_masks, src_masks,
                   matching_scores, transform, positive_radius):
    # Pure-JAX mirror of the PyTorch forward (for verification only).
    R = transform[:3, :3]
    t = transform[:3, 3]
    src_t = src_points @ R.T + t
    diff = ref_points[:, :, None, :] - src_t[:, None, :, :]
    dists = jnp.sum(diff * diff, axis=-1)
    gt_masks = ref_masks[:, :, None] & src_masks[:, None, :]
    gt_corr = (dists < positive_radius ** 2) & gt_masks
    slack_row = (jnp.sum(gt_corr, 2) == 0) & ref_masks
    slack_col = (jnp.sum(gt_corr, 1) == 0) & src_masks
    labels = jnp.zeros(matching_scores.shape, bool)
    labels = labels.at[:, :-1, :-1].set(gt_corr)
    labels = labels.at[:, :-1, -1].set(slack_row)
    labels = labels.at[:, -1, :-1].set(slack_col)
    total = jnp.sum(jnp.where(labels, matching_scores, 0.0))
    count = jnp.sum(labels).astype(jnp.float32)
    return -total / count


if __name__ == "__main__":
    key = jax.random.PRNGKey(0)
    B, N, M = 2, 16, 16
    positive_radius = 0.2

    k1, k2, k3, k4, k5 = jax.random.split(key, 5)

    ref_points = jax.random.uniform(k1, (B, N, 3), dtype=jnp.float32)

    # Deterministic small rigid transform (rotation about z + translation).
    ang = 0.1
    R = jnp.array([[jnp.cos(ang), -jnp.sin(ang), 0.0],
                   [jnp.sin(ang),  jnp.cos(ang), 0.0],
                   [0.0,           0.0,          1.0]], dtype=jnp.float32)
    t = jnp.array([0.05, -0.02, 0.03], dtype=jnp.float32)
    transform = jnp.eye(4, dtype=jnp.float32).at[:3, :3].set(R).at[:3, 3].set(t)

    # src points chosen so that apply_transform(src) ~= ref (guarantees positives).
    noise = 0.02 * jax.random.normal(k2, (B, N, 3), dtype=jnp.float32)
    src_points = (ref_points + noise - t) @ R   # inverse transform of (ref + noise)

    ref_masks = jax.random.uniform(k3, (B, N)) > 0.2
    src_masks = jax.random.uniform(k4, (B, M)) > 0.2
    matching_scores = jax.random.normal(k5, (B, N + 1, M + 1), dtype=jnp.float32)

    loss = fine_matching_loss(ref_points, src_points, ref_masks, src_masks,
                              matching_scores, transform, positive_radius)
    loss = jax.block_until_ready(loss)

    ref = reference_loss(ref_points, src_points, ref_masks, src_masks,
                         matching_scores, transform, positive_radius)
    ref = jax.block_until_ready(ref)

    assert jnp.abs(loss - ref) < 1e-5, (loss, ref)
    print("KERNEL_OK")
</pallas_src>

<mosaic_0001>
module attributes {stable_mosaic.version = 11 : i64} {
  func.func @_fine_matching_kernel(%arg0: i32, %arg1: memref<2x16x4xf32, #tpu.memory_space<vmem>>, %arg2: memref<2x4x16xf32, #tpu.memory_space<vmem>>, %arg3: memref<2x17x17xf32, #tpu.memory_space<vmem>>, %arg4: memref<1x2xf32, #tpu.memory_space<smem>>) attributes {dimension_semantics = [#tpu.dimension_semantics<parallel>], iteration_bounds = array<i64: 1>, scalar_prefetch = 0 : i64, scratch_operands = 0 : i64, tpu.core_type = #tpu.core_type<tc>, window_params = [{transform_indices = @transform_0, window_bounds = array<i64: 2, 16, 4>}, {transform_indices = @transform_1, window_bounds = array<i64: 2, 4, 16>}, {transform_indices = @transform_2, window_bounds = array<i64: 2, 17, 17>}, {transform_indices = @transform_3, window_bounds = array<i64: 1, 2>}]} {
    %c0 = arith.constant 0 : index
    %c0_0 = arith.constant 0 : index
    %c0_1 = arith.constant 0 : index
    %0 = vector.load %arg1[%c0, %c0_0, %c0_1] : memref<2x16x4xf32, #tpu.memory_space<vmem>>, vector<2x16x4xf32>
    %c0_2 = arith.constant 0 : index
    %c0_3 = arith.constant 0 : index
    %c0_4 = arith.constant 0 : index
    %1 = vector.load %arg2[%c0_2, %c0_3, %c0_4] : memref<2x4x16xf32, #tpu.memory_space<vmem>>, vector<2x4x16xf32>
    %c0_5 = arith.constant 0 : index
    %c0_6 = arith.constant 0 : index
    %c0_7 = arith.constant 0 : index
    %2 = vector.load %arg3[%c0_5, %c0_6, %c0_7] : memref<2x17x17xf32, #tpu.memory_space<vmem>>, vector<2x17x17xf32>
    %3 = vector.extract_strided_slice %0 {offsets = [0, 0, 3], sizes = [2, 16, 1], strides = [1, 1, 1]} : vector<2x16x4xf32> to vector<2x16x1xf32>
    %4 = vector.extract_strided_slice %1 {offsets = [0, 3, 0], sizes = [2, 1, 16], strides = [1, 1, 1]} : vector<2x4x16xf32> to vector<2x1x16xf32>
    %5 = vector.extract_strided_slice %0 {offsets = [0, 0, 0], sizes = [2, 16, 1], strides = [1, 1, 1]} : vector<2x16x4xf32> to vector<2x16x1xf32>
    %6 = vector.extract_strided_slice %1 {offsets = [0, 0, 0], sizes = [2, 1, 16], strides = [1, 1, 1]} : vector<2x4x16xf32> to vector<2x1x16xf32>
    %7 = vector.broadcast %5 : vector<2x16x1xf32> to vector<2x16x16xf32>
    %8 = vector.broadcast %6 : vector<2x1x16xf32> to vector<2x16x16xf32>
    %9 = arith.subf %7, %8 : vector<2x16x16xf32>
    %10 = vector.extract_strided_slice %0 {offsets = [0, 0, 1], sizes = [2, 16, 1], strides = [1, 1, 1]} : vector<2x16x4xf32> to vector<2x16x1xf32>
    %11 = vector.extract_strided_slice %1 {offsets = [0, 1, 0], sizes = [2, 1, 16], strides = [1, 1, 1]} : vector<2x4x16xf32> to vector<2x1x16xf32>
    %12 = vector.broadcast %10 : vector<2x16x1xf32> to vector<2x16x16xf32>
    %13 = vector.broadcast %11 : vector<2x1x16xf32> to vector<2x16x16xf32>
    %14 = arith.subf %12, %13 : vector<2x16x16xf32>
    %15 = vector.extract_strided_slice %0 {offsets = [0, 0, 2], sizes = [2, 16, 1], strides = [1, 1, 1]} : vector<2x16x4xf32> to vector<2x16x1xf32>
    %16 = vector.extract_strided_slice %1 {offsets = [0, 2, 0], sizes = [2, 1, 16], strides = [1, 1, 1]} : vector<2x4x16xf32> to vector<2x1x16xf32>
    %17 = vector.broadcast %15 : vector<2x16x1xf32> to vector<2x16x16xf32>
    %18 = vector.broadcast %16 : vector<2x1x16xf32> to vector<2x16x16xf32>
    %19 = arith.subf %17, %18 : vector<2x16x16xf32>
    %20 = arith.mulf %9, %9 : vector<2x16x16xf32>
    %21 = arith.mulf %14, %14 : vector<2x16x16xf32>
    %22 = arith.addf %20, %21 : vector<2x16x16xf32>
    %23 = arith.mulf %19, %19 : vector<2x16x16xf32>
    %24 = arith.addf %22, %23 : vector<2x16x16xf32>
    %cst = arith.constant 4.000000e-02 : f32
    %25 = vector.broadcast %cst : f32 to vector<2x16x16xf32>
    %26 = arith.cmpf olt, %24, %25 : vector<2x16x16xf32>
    %27 = vector.broadcast %3 : vector<2x16x1xf32> to vector<2x16x16xf32>
    %28 = vector.broadcast %4 : vector<2x1x16xf32> to vector<2x16x16xf32>
    %29 = arith.mulf %27, %28 : vector<2x16x16xf32>
    %cst_8 = arith.constant 0.000000e+00 : f32
    %30 = vector.broadcast %cst_8 : f32 to vector<2x16x16xf32>
    %31 = arith.select %26, %29, %30 : vector<2x16x16xi1>, vector<2x16x16xf32>
    %cst_9 = arith.constant dense<0.000000e+00> : vector<2x16xf32>
    %32 = vector.multi_reduction <add>, %31, %cst_9 [2] : vector<2x16x16xf32> to vector<2x16xf32>
    %33 = vector.shape_cast %32 : vector<2x16xf32> to vector<2x16x1xf32>
    %cst_10 = arith.constant dense<0.000000e+00> : vector<2x16xf32>
    %34 = vector.multi_reduction <add>, %31, %cst_10 [1] : vector<2x16x16xf32> to vector<2x16xf32>
    %35 = vector.shape_cast %34 : vector<2x16xf32> to vector<2x1x16xf32>
    %cst_11 = arith.constant 0.000000e+00 : f32
    %36 = vector.broadcast %cst_11 : f32 to vector<2x16x1xf32>
    %37 = arith.cmpf oeq, %33, %36 : vector<2x16x1xf32>
    %cst_12 = arith.constant 0.000000e+00 : f32
    %38 = vector.broadcast %cst_12 : f32 to vector<2x16x1xf32>
    %39 = arith.select %37, %3, %38 : vector<2x16x1xi1>, vector<2x16x1xf32>
    %cst_13 = arith.constant 0.000000e+00 : f32
    %40 = vector.broadcast %cst_13 : f32 to vector<2x1x16xf32>
    %41 = arith.cmpf oeq, %35, %40 : vector<2x1x16xf32>
    %cst_14 = arith.constant 0.000000e+00 : f32
    %42 = vector.broadcast %cst_14 : f32 to vector<2x1x16xf32>
    %43 = arith.select %41, %4, %42 : vector<2x1x16xi1>, vector<2x1x16xf32>
    %44 = vector.extract_strided_slice %2 {offsets = [0, 0, 0], sizes = [2, 16, 16], strides = [1, 1, 1]} : vector<2x17x17xf32> to vector<2x16x16xf32>
    %45 = vector.extract_strided_slice %2 {offsets = [0, 0, 16], sizes = [2, 16, 1], strides = [1, 1, 1]} : vector<2x17x17xf32> to vector<2x16x1xf32>
    %46 = vector.extract_strided_slice %2 {offsets = [0, 16, 0], sizes = [2, 1, 16], strides = [1, 1, 1]} : vector<2x17x17xf32> to vector<2x1x16xf32>
    %47 = arith.mulf %44, %31 : vector<2x16x16xf32>
    %48 = vector.shape_cast %47 : vector<2x16x16xf32> to vector<1x2x16x16xf32>
    %cst_15 = arith.constant dense<0.000000e+00> : vector<1xf32>
    %49 = vector.multi_reduction <add>, %48, %cst_15 [1, 2, 3] : vector<1x2x16x16xf32> to vector<1xf32>
    %50 = vector.shape_cast %49 : vector<1xf32> to vector<1x1x1x1xf32>
    %51 = vector.extract %50[0, 0, 0, 0] : f32 from vector<1x1x1x1xf32>
    %52 = arith.mulf %45, %39 : vector<2x16x1xf32>
    %53 = vector.shape_cast %52 : vector<2x16x1xf32> to vector<1x2x16x1xf32>
    %cst_16 = arith.constant dense<0.000000e+00> : vector<1xf32>
    %54 = vector.multi_reduction <add>, %53, %cst_16 [1, 2, 3] : vector<1x2x16x1xf32> to vector<1xf32>
    %55 = vector.shape_cast %54 : vector<1xf32> to vector<1x1x1x1xf32>
    %56 = vector.extract %55[0, 0, 0, 0] : f32 from vector<1x1x1x1xf32>
    %57 = arith.addf %51, %56 : f32
    %58 = arith.mulf %46, %43 : vector<2x1x16xf32>
    %59 = vector.shape_cast %58 : vector<2x1x16xf32> to vector<1x2x1x16xf32>
    %cst_17 = arith.constant dense<0.000000e+00> : vector<1xf32>
    %60 = vector.multi_reduction <add>, %59, %cst_17 [1, 2, 3] : vector<1x2x1x16xf32> to vector<1xf32>
    %61 = vector.shape_cast %60 : vector<1xf32> to vector<1x1x1x1xf32>
    %62 = vector.extract %61[0, 0, 0, 0] : f32 from vector<1x1x1x1xf32>
    %63 = arith.addf %57, %62 : f32
    %64 = vector.shape_cast %31 : vector<2x16x16xf32> to vector<1x2x16x16xf32>
    %cst_18 = arith.constant dense<0.000000e+00> : vector<1xf32>
    %65 = vector.multi_reduction <add>, %64, %cst_18 [1, 2, 3] : vector<1x2x16x16xf32> to vector<1xf32>
    %66 = vector.shape_cast %65 : vector<1xf32> to vector<1x1x1x1xf32>
    %67 = vector.extract %66[0, 0, 0, 0] : f32 from vector<1x1x1x1xf32>
    %68 = vector.shape_cast %39 : vector<2x16x1xf32> to vector<1x2x16x1xf32>
    %cst_19 = arith.constant dense<0.000000e+00> : vector<1xf32>
    %69 = vector.multi_reduction <add>, %68, %cst_19 [1, 2, 3] : vector<1x2x16x1xf32> to vector<1xf32>
    %70 = vector.shape_cast %69 : vector<1xf32> to vector<1x1x1x1xf32>
    %71 = vector.extract %70[0, 0, 0, 0] : f32 from vector<1x1x1x1xf32>
    %72 = arith.addf %67, %71 : f32
    %73 = vector.shape_cast %43 : vector<2x1x16xf32> to vector<1x2x1x16xf32>
    %cst_20 = arith.constant dense<0.000000e+00> : vector<1xf32>
    %74 = vector.multi_reduction <add>, %73, %cst_20 [1, 2, 3] : vector<1x2x1x16xf32> to vector<1xf32>
    %75 = vector.shape_cast %74 : vector<1xf32> to vector<1x1x1x1xf32>
    %76 = vector.extract %75[0, 0, 0, 0] : f32 from vector<1x1x1x1xf32>
    %77 = arith.addf %72, %76 : f32
    %c0_21 = arith.constant 0 : index
    %c0_22 = arith.constant 0 : index
    %78 = memref.load %arg4[%c0_21, %c0_22] : memref<1x2xf32, #tpu.memory_space<smem>>
    memref.store %63, %arg4[%c0_21, %c0_22] : memref<1x2xf32, #tpu.memory_space<smem>>
    %c0_23 = arith.constant 0 : index
    %c1 = arith.constant 1 : index
    %79 = memref.load %arg4[%c0_23, %c1] : memref<1x2xf32, #tpu.memory_space<smem>>
    memref.store %77, %arg4[%c0_23, %c1] : memref<1x2xf32, #tpu.memory_space<smem>>
    return
  }
  func.func @transform_0(%arg0: i32) -> (i32, i32, i32) {
    %c0_i32 = arith.constant 0 : i32
    %c0_i32_0 = arith.constant 0 : i32
    %c0_i32_1 = arith.constant 0 : i32
    return %arg0, %c0_i32, %c0_i32_0 : i32, i32, i32
  }
  func.func @transform_1(%arg0: i32) -> (i32, i32, i32) {
    %c0_i32 = arith.constant 0 : i32
    %c0_i32_0 = arith.constant 0 : i32
    %c0_i32_1 = arith.constant 0 : i32
    return %arg0, %c0_i32, %c0_i32_0 : i32, i32, i32
  }
  func.func @transform_2(%arg0: i32) -> (i32, i32, i32) {
    %c0_i32 = arith.constant 0 : i32
    %c0_i32_0 = arith.constant 0 : i32
    %c0_i32_1 = arith.constant 0 : i32
    return %arg0, %c0_i32, %c0_i32_0 : i32, i32, i32
  }
  func.func @transform_3(%arg0: i32) -> (i32, i32) {
    %c0_i32 = arith.constant 0 : i32
    %c0_i32_0 = arith.constant 0 : i32
    return %arg0, %c0_i32 : i32, i32
  }
}

</mosaic_0001>

<bundles_post_ra>
// kernel: tpu_custom_call.1
= control target key start
LH: loop header
LB: loop body
LE: loop exit
PB: predicated region body
PF: predicated region fallthrough
CT: control target
= control target key end

     0   :  { %v400_v2 = vmov 1   ;;  %v401_v3 = vmov 0   ;;  %s545_s0 = inlined_call_operand.vmem [shape: f32[2,16,4], index: 0, kind: input, shape index: {}]   ;;  %s546_s1 = inlined_call_operand.vmem [shape: f32[2,4,16], index: 1, kind: input, shape index: {}]   ;;  %s547_s2 = inlined_call_operand.vmem [shape: f32[2,17,17], index: 2, kind: input, shape index: {}]   ;;  %s548_s3 = inlined_call_operand.hbm [shape: f32[1,2], index: 3, kind: output, shape index: {}]  }
   0x1   :  { %v431_v0 = vld [vmem:[%s545_s0 + $0x10] sm:$0xff]  ;;  %v436_v1 = vld [vmem:[%s545_s0] sm:$0xff]  ;;  %375 = vset.pattern.permute.xlu1 %v400_v2  ;;  %376 = vset.pattern.permute.xlu2 %v401_v3 }
   0x2   :  { %8 = vsyncpa [#allocation3], 0  ;;  %374 = vset.pattern.permute.xlu0 %v401_v3  ;;  %39 = vperm.xlu2 %376, %v431_v0   ;;  %v444_v4 = vld [vmem:[%s545_s0 + $0x8] sm:$0xff]  ;;  %v452_v5 = vld [vmem:[%s545_s0 + $0x18] sm:$0xff]  ;;  %v402_v6 = vmov 2   ;;  %v403_v7 = vmov 3  }
   0x3   :  { %54 = vperm.xlu1 %375, %v436_v1   ;;  %29 = vperm.xlu0 %374, %v436_v1   ;;  %v467_v13 = vld [vmem:[%s546_s1] sm:$0xf]  ;;  %v475_v22 = vld [vmem:[%s546_s1 + $0x4] sm:$0xf]  ;;  %v484_v39 = vld [vmem:[%s547_s2 + $0x8] sm:$0xff]  ;;  %vm147_vm0 = vcmask 130048  }
   0x4   :  { %v69_v16 = vperm.slane %v467_v13, 1  ;;  %v47_v17 = vperm.slane %v467_v13, 0  ;;  %v91_v21 = vperm.slane %v467_v13, 2  ;;  %v137_v26 = vperm.slane %v467_v13, 3  ;;  %s404_s7 = smov 13   ;;  %s405_s8 = smov 125  }
   0x5   :  { %v48_v30 = vperm.slane %v475_v22, 0  ;;  %v70_v31 = vperm.slane %v475_v22, 1  ;;  %v92_v34 = vperm.slane %v475_v22, 2  ;;  %v138_v60 = vperm.slane %v475_v22, 3  ;;  %s344_s18 = sshll.u32 %s548_s3, 4  ;;  %s407_s21 = smov [#allocation2]   ;;  %s345_s18 = int_to_ptr.hbm [resolvable:$true] %s344_s18 }
   0x6   :  { %vm268_vm7 = vcmask 122880   ;;  %vm242_vm12 = vcmask 7168  }
   0xa   :  { %377 = vset.pattern.permute.xlu2 %v400_v2 }
   0xb   :  { %58 = vperm.xlu1 %375, %v444_v4   ;;  %34 = vperm.xlu0 %374, %v444_v4  }
   0xc   :  { %62 = vperm.xlu2 %377, %v431_v0  }
  0x13   :  { %379 = vset.pattern.permute.xlu1 %v402_v6  ;;  %378 = vset.pattern.permute.xlu0 %v402_v6 }
  0x14   :  { %380 = vset.pattern.permute.xlu2 %v401_v3  ;;  %80 = vperm.xlu1 %379, %v444_v4  }
  0x15   :  { %76 = vperm.xlu0 %378, %v436_v1   ;;  %44 = vperm.xlu2 %380, %v452_v5  }
  0x1c   :  { %381 = vset.pattern.permute.xlu1 %v400_v2 }
  0x1d   :  { %88 = vperm.xlu0 %378, %v452_v5   ;;  %382 = vset.pattern.permute.xlu2 %v402_v6 }
  0x1e   :  { %66 = vperm.xlu1 %381, %v452_v5   ;;  %84 = vperm.xlu2 %382, %v431_v0  }
  0x25   :  { %385 = vset.pattern.permute.xlu0 %v403_v7 }
  0x26   :  { %383 = vset.pattern.permute.xlu1 %v403_v7  ;;  %130 = vperm.xlu0 %385, %v431_v0  }
  0x27   :  { %122 = vperm.xlu1 %383, %v436_v1   ;;  %384 = vset.pattern.permute.xlu2 %v403_v7  ;;  %v493_v7 = vld [vmem:[%s547_s2 + $0x18] sm:$0xff] }
  0x28   :  { %126 = vperm.xlu2 %384, %v444_v4  }
  0x2f   :  { %134 = vperm.xlu1 %383, %v452_v5  }
  0x5c   :  { %v40_v8 = vpop.permute.xlu2 %39 }
  0x5d   :  { %v51_v37 = vsub.f32 %v40_v8, %v48_v30 }
  0x5f   :  { %v99_v48 = vmul.f32 %v51_v37, %v51_v37 }
  0x66   :  { %v63_v9 = vpop.permute.xlu2 %62 }
  0x67   :  { %v73_v38 = vsub.f32 %v63_v9, %v70_v31 }
  0x69   :  { %v103_v49 = vmul.f32 %v73_v38, %v73_v38 }
  0x6b   :  { %v107_v57 = vadd.f32 %v103_v49, %v99_v48 }
  0x6f   :  { %v45_v10 = vpop.permute.xlu2 %44 }
  0x70   :  { %v52_v58 = vsub.f32 %v45_v10, %v48_v30  ;;  %v498_v10 = vld [vmem:[%s547_s2] sm:$0xff] }
  0x72   :  { %v100_v3 = vmul.f32 %v52_v58, %v52_v58 }
  0x75   :  { %v55_v11 = vpop.permute.xlu1 %54  ;;  %v30_v12 = vpop.permute.xlu0 %29 }
  0x76   :  { %v71_v40 = vsub.f32 %v55_v11, %v69_v16  ;;  %v49_v41 = vsub.f32 %v30_v12, %v47_v17 }
  0x78   :  { %v85_v18 = vpop.permute.xlu2 %84  ;;  %v101_v51 = vmul.f32 %v71_v40, %v71_v40  ;;  %v97_v52 = vmul.f32 %v49_v41, %v49_v41 }
  0x79   :  { %v95_v42 = vsub.f32 %v85_v18, %v92_v34 }
  0x7a   :  { %v105_v59 = vadd.f32 %v101_v51, %v97_v52 }
  0x7b   :  { %v111_v54 = vmul.f32 %v95_v42, %v95_v42 }
  0x7d   :  { %v59_v14 = vpop.permute.xlu1 %58  ;;  %v35_v15 = vpop.permute.xlu0 %34  ;;  %v115_v61 = vadd.f32 %v111_v54, %v107_v57  ;;  %v23_v54 = vld [vmem:[%s547_s2 + $0x10] sm:$0x1] }
  0x7e   :  { %v72_v19 = vsub.f32 %v59_v14, %v69_v16  ;;  %v50_v20 = vsub.f32 %v35_v15, %v47_v17 }
  0x7f   :  { %vm119_vm2 = vcmp.lt.f32.partialorder %v115_v61, 0.04 }
  0x80   :  { %v102_v23 = vmul.f32 %v72_v19, %v72_v19  ;;  %v98_v24 = vmul.f32 %v50_v20, %v50_v20 }
  0x82   :  { %v127_v29 = vpop.permute.xlu2 %126  ;;  %v106_v32 = vadd.f32 %v102_v23, %v98_v24 }
  0x83   :  { %v140_v35 = vmul.f32 %v137_v26, %v127_v29 }
  0x86   :  { %v81_v25 = vpop.permute.xlu1 %80 }
  0x87   :  { %v94_v27 = vsub.f32 %v81_v25, %v91_v21  ;;  %v77_v28 = vpop.permute.xlu0 %76 }
  0x88   :  { %v93_v44 = vsub.f32 %v77_v28, %v91_v21 }
  0x89   :  { %v110_v33 = vmul.f32 %v94_v27, %v94_v27 }
  0x8a   :  { %v109_v55 = vmul.f32 %v93_v44, %v93_v44 }
  0x8b   :  { %v114_v36 = vadd.f32 %v110_v33, %v106_v32 }
  0x8c   :  { %v113_v63 = vadd.f32 %v109_v55, %v105_v59  ;;  %v26_v55 = vld [vmem:[%s547_s2 + $0x28] sm:$0x1] }
  0x8d   :  { %vm118_vm1 = vcmp.lt.f32.partialorder %v114_v36, 0.04 }
  0x8e   :  { %v144_v43 = vsel %vm118_vm1, %v140_v35, 0.0  ;;  %vm117_vm3 = vcmp.lt.f32.partialorder %v113_v63, 0.04 }
  0x8f   :  { %v89_v45 = vpop.permute.xlu0 %88  ;;  %v151_v46 = vsel %vm147_vm0, %v144_v43, 0.0  ;;  %v187_v47 = vmul.f32 %v144_v43, %v484_v39 }
  0x90   :  { %v67_v50 = vpop.permute.xlu1 %66  ;;  %152 = vadd.xlane.f32.xlu1 %v151_v46  ;;  %v96_v6 = vsub.f32 %v89_v45, %v92_v34 }
  0x91   :  { %v191_v53 = vsel %vm147_vm0, %v187_v47, 0.0  ;;  %v74_v56 = vsub.f32 %v67_v50, %v70_v31  ;;  %v509_v31 = vld [vmem:[%s547_s2 + $0x20] sm:$0xff]  ;;  %s406_s2 = smov 112  }
  0x92   :  { %v112_v18 = vmul.f32 %v96_v6, %v96_v6 }
  0x93   :  { %v104_v62 = vmul.f32 %v74_v56, %v74_v56 }
  0x95   :  { %v108_v12 = vadd.f32 %v104_v62, %v100_v3 }
  0x97   :  { %v116_v25 = vadd.f32 %v112_v18, %v108_v12 }
  0x98   :  { %v131_v2 = vpop.permute.xlu0 %130 }
  0x99   :  { %v141_v8 = vmul.f32 %v138_v60, %v131_v2  ;;  %v123_v9 = vpop.permute.xlu1 %122  ;;  %vm120_vm4 = vcmp.lt.f32.partialorder %v116_v25, 0.04 }
  0x9a   :  { %v139_v11 = vmul.f32 %v137_v26, %v123_v9 }
  0x9b   :  { %v145_v14 = vsel %vm119_vm2, %v141_v8, 0.0 }
  0x9c   :  { %v188_v15 = vmul.f32 %v145_v14, %v493_v7  ;;  %v154_v16 = vsel %vm147_vm0, %v145_v14, 0.0  ;;  %v143_v17 = vsel %vm117_vm3, %v139_v11, 0.0 }
  0x9d   :  { %155 = vadd.xlane.f32.xlu0 %v154_v16  ;;  %v148_v19 = vsel %vm147_vm0, %v143_v17, 0.0  ;;  %v186_v20 = vmul.f32 %v143_v17, %v498_v10 }
  0x9e   :  { %149 = vadd.xlane.f32.xlu2 %v148_v19  ;;  %v160_v21 = vadd.f32 %v151_v46, %v148_v19  ;;  %v193_v23 = vsel %vm147_vm0, %v188_v15, 0.0 }
  0x9f   :  { %v190_v24 = vsel %vm147_vm0, %v186_v20, 0.0 }
  0xa0   :  { %v161_v26 = vrot.slane %v160_v21, 4  ;;  %v192_v27 = vadd.f32 %v191_v53, %v190_v24  ;;  %v282_v28 = vadd.f32 %v160_v21, %v154_v16 }
  0xa1   :  { %v135_v29 = vpop.permute.xlu1 %134 }
  0xa2   :  { %v162_v30 = vadd.f32 %v161_v26, %v160_v21  ;;  %v142_v32 = vmul.f32 %v138_v60, %v135_v29  ;;  %v194_v33 = vadd.f32 %v193_v23, %v192_v27 }
  0xa4   :  { %v163_v34 = vrot.slane %v162_v30, 2  ;;  %v146_v35 = vsel %vm120_vm4, %v142_v32, 0.0 }
  0xa5   :  { %v189_v36 = vmul.f32 %v146_v35, %v509_v31  ;;  %v157_v37 = vsel %vm147_vm0, %v146_v35, 0.0 }
  0xa6   :  { %v164_v38 = vadd.f32 %v163_v34, %v162_v30  ;;  %158 = vadd.xlane.f32.xlu2 %v157_v37  ;;  %v167_v40 = vadd.f32 %v157_v37, %v154_v16  ;;  %v283_v41 = vadd.f32 %v282_v28, %v157_v37 }
  0xa7   :  { %v195_v42 = vsel %vm147_vm0, %v189_v36, 0.0 }
  0xa8   :  { %v165_v43 = vrot.slane %v164_v38, 1  ;;  %v168_v44 = vrot.slane %v167_v40, 4  ;;  %v196_v45 = vadd.f32 %v195_v42, %v194_v33 }
  0xaa   :  { %v169_v46 = vadd.f32 %v168_v44, %v167_v40  ;;  %v166_v47 = vadd.f32 %v165_v43, %v164_v38 }
  0xac   :  { %v170_v48 = vrot.slane %v169_v46, 2  ;;  %vm182_vm5 = vcmp.eq.f32.partialorder %v166_v47, 0.0 }
  0xad   :  { %v184_v50 = vsel %vm182_vm5, %v467_v13, 0.0 }
  0xae   :  { %v171_v49 = vadd.f32 %v170_v48, %v169_v46  ;;  %v262_v53 = vrot.slane %v184_v50, 3 }
  0xb0   :  { %v172_v51 = vrot.slane %v171_v49, 1  ;;  %v266_v58 = vmul.f32 %v262_v53, %v23_v54  ;;  %v322_v60 = vsel %vm268_vm7, %v262_v53, 0.0 }
  0xb2   :  { %v173_v52 = vadd.f32 %v172_v51, %v171_v49  ;;  %v269_v62 = vsel %vm268_vm7, %v266_v58, 0.0 }
  0xb4   :  { %vm183_vm6 = vcmp.eq.f32.partialorder %v173_v52, 0.0 }
  0xb5   :  { %v185_v56 = vsel %vm183_vm6, %v475_v22, 0.0 }
  0xb6   :  { %v263_v57 = vrot.slane %v185_v56, 3 }
  0xb8   :  { %v267_v59 = vmul.f32 %v263_v57, %v26_v55  ;;  %v323_v13 = vsel %vm268_vm7, %v263_v57, 0.0 }
  0xb9   :  { %v324_v61 = vadd.f32 %v323_v13, %v322_v60 }
  0xba   :  { %v270_v63 = vsel %vm268_vm7, %v267_v59, 0.0 }
  0xbb   :  { %v271_v2 = vadd.f32 %v270_v63, %v269_v62 }
 0x103   :  { %v153_v3 = vpop.xlane.xlu1 %152 }
 0x104   :  { %vm175_vm8 = vcmp.eq.f32.partialorder %v153_v3, 0.0 }
 0x105   :  { %v179_v6 = vsel %vm175_vm8, %v444_v4, 0.0 }
 0x106   :  { %212 = vrot.lane.b32.xlu1 %v179_v6, %s404_s7 }
 0x10e   :  { %295 = vrot.lane.b32.xlu1 %v179_v6, %s405_s8 }
 0x110   :  { %v156_v22 = vpop.xlane.xlu0 %155 }
 0x111   :  { %vm176_vm9 = vcmp.eq.f32.partialorder %v156_v22, 0.0  ;;  %v150_v8 = vpop.xlane.xlu2 %149 }
 0x112   :  { %v180_v9 = vsel %vm176_vm9, %v431_v0, 0.0  ;;  %vm174_vm10 = vcmp.eq.f32.partialorder %v150_v8, 0.0 }
 0x113   :  { %v178_v11 = vsel %vm174_vm10, %v436_v1, 0.0  ;;  %214 = vrot.lane.b32.xlu0 %v180_v9, %s404_s7 }
 0x114   :  { %210 = vrot.lane.b32.xlu2 %v178_v11, %s404_s7 }
 0x119   :  { %v159_v12 = vpop.xlane.xlu2 %158 }
 0x11a   :  { %vm177_vm11 = vcmp.eq.f32.partialorder %v159_v12, 0.0 }
 0x11b   :  { %v181_v14 = vsel %vm177_vm11, %v452_v5, 0.0 }
 0x11c   :  { %216 = vrot.lane.b32.xlu2 %v181_v14, %s404_s7 }
 0x124   :  { %293 = vrot.lane.b32.xlu2 %v178_v11, %s405_s8 }
 0x12c   :  { %297 = vrot.lane.b32.xlu2 %v180_v9, %s405_s8 }
 0x155   :  { %197 = vadd.xlane.f32.xlu2 %v196_v45 }
 0x15d   :  { %284 = vadd.xlane.f32.xlu2 %v283_v41 }
 0x16e   :  { %v211_v4 = vpop.permute.xlu2 %210 }
 0x16f   :  { %v222_v15 = vmul.f32 %v211_v4, %v498_v10 }
 0x171   :  { %230 = vrot.lane.b32.xlu1 %v222_v15, %s406_s2 }
 0x176   :  { %v217_v0 = vpop.permute.xlu2 %216 }
 0x177   :  { %v225_v1 = vmul.f32 %v217_v0, %v509_v31 }
 0x178   :  { %v213_v16 = vpop.permute.xlu1 %212 }
 0x179   :  { %v223_v17 = vmul.f32 %v213_v16, %v484_v39  ;;  %236 = vrot.lane.b32.xlu1 %v225_v1, %s406_s2 }
 0x17b   :  { %232 = vrot.lane.b32.xlu0 %v223_v17, %s406_s2 }
 0x17e   :  { %v294_v5 = vpop.permute.xlu2 %293 }
 0x17f   :  { %v305_v20 = vsel %vm242_vm12, %v294_v5, 0.0 }
 0x180   :  { %v296_v18 = vpop.permute.xlu1 %295 }
 0x181   :  { %v306_v19 = vsel %vm242_vm12, %v296_v18, 0.0 }
 0x182   :  { %v307_v23 = vadd.f32 %v306_v19, %v305_v20 }
 0x185   :  { %v215_v21 = vpop.permute.xlu0 %214 }
 0x186   :  { %v224_v10 = vmul.f32 %v215_v21, %v493_v7  ;;  %v298_v24 = vpop.permute.xlu2 %297 }
 0x187   :  { %v308_v25 = vsel %vm242_vm12, %v298_v24, 0.0 }
 0x188   :  { %v309_v26 = vadd.f32 %v308_v25, %v307_v23  ;;  %234 = vrot.lane.b32.xlu0 %v224_v10, %s406_s2 }
 0x190   :  { %299 = vrot.lane.b32.xlu0 %v181_v14, %s405_s8 }
 0x1ba   :  { %272 = vadd.xlane.f32.xlu0 %v271_v2 }
 0x1c2   :  { %325 = vadd.xlane.f32.xlu0 %v324_v61 }
 0x1c8   :  { %v198_v39 = vpop.xlane.xlu2 %197 }
 0x1c9   :  { %v199_v27 = vrot.slane %v198_v39, 4 }
 0x1cb   :  { %v200_v28 = vadd.f32 %v199_v27, %v198_v39 }
 0x1cd   :  { %v201_v29 = vrot.slane %v200_v28, 2 }
 0x1cf   :  { %v202_v30 = vadd.f32 %v201_v29, %v200_v28 }
 0x1d0   :  { %v285_v48 = vpop.xlane.xlu2 %284 }
 0x1d1   :  { %v203_v31 = vrot.slane %v202_v30, 1  ;;  %v286_v50 = vrot.slane %v285_v48, 4 }
 0x1d3   :  { %v204_v32 = vadd.f32 %v203_v31, %v202_v30  ;;  %v287_v52 = vadd.f32 %v286_v50, %v285_v48 }
 0x1d5   :  { %354 = vpush %v204_v32  ;;  %v288_v57 = vrot.slane %v287_v52, 2 }
 0x1d7   :  { %v289_v61 = vadd.f32 %v288_v57, %v287_v52 }
 0x1d9   :  { %v290_v9 = vrot.slane %v289_v61, 1 }
 0x1db   :  { %v291_v0 = vadd.f32 %v290_v9, %v289_v61 }
 0x1e3   :  { %v231_v33 = vpop.permute.xlu1 %230 }
 0x1e4   :  { %v243_v35 = vsel %vm242_vm12, %v231_v33, 0.0 }
 0x1eb   :  { %v237_v36 = vpop.permute.xlu1 %236 }
 0x1ec   :  { %v248_v42 = vsel %vm242_vm12, %v237_v36, 0.0 }
 0x1ed   :  { %v233_v34 = vpop.permute.xlu0 %232 }
 0x1ee   :  { %v244_v7 = vsel %vm242_vm12, %v233_v34, 0.0 }
 0x1ef   :  { %v245_v37 = vadd.f32 %v244_v7, %v243_v35 }
 0x1fa   :  { %v235_v38 = vpop.permute.xlu0 %234 }
 0x1fb   :  { %v246_v40 = vsel %vm242_vm12, %v235_v38, 0.0 }
 0x1fc   :  { %v247_v41 = vadd.f32 %v246_v40, %v245_v37 }
 0x1fe   :  { %v249_v43 = vadd.f32 %v248_v42, %v247_v41 }
 0x200   :  { %250 = vadd.xlane.f32.xlu1 %v249_v43 }
 0x202   :  { %v300_v44 = vpop.permute.xlu0 %299 }
 0x203   :  { %v310_v45 = vsel %vm242_vm12, %v300_v44, 0.0 }
 0x204   :  { %v311_v46 = vadd.f32 %v310_v45, %v309_v26 }
 0x206   :  { %s355_s9 = spop %354 }
 0x208   :  { %312 = vadd.xlane.f32.xlu1 %v311_v46 }
 0x22d   :  { %v273_v47 = vpop.xlane.xlu0 %272 }
 0x22e   :  { %v274_v49 = vrot.slane %v273_v47, 4 }
 0x230   :  { %v275_v51 = vadd.f32 %v274_v49, %v273_v47 }
 0x232   :  { %v276_v54 = vrot.slane %v275_v51, 2 }
 0x234   :  { %v277_v13 = vadd.f32 %v276_v54, %v275_v51 }
 0x235   :  { %v326_v53 = vpop.xlane.xlu0 %325 }
 0x236   :  { %v327_v55 = vrot.slane %v326_v53, 4  ;;  %v278_v6 = vrot.slane %v277_v13, 1 }
 0x238   :  { %v328_v60 = vadd.f32 %v327_v55, %v326_v53  ;;  %v279_v4 = vadd.f32 %v278_v6, %v277_v13 }
 0x23a   :  { %v329_v2 = vrot.slane %v328_v60, 2 }
 0x23c   :  { %v330_v14 = vadd.f32 %v329_v2, %v328_v60 }
 0x23e   :  { %v331_v16 = vrot.slane %v330_v14, 1 }
 0x240   :  { %v332_v18 = vadd.f32 %v331_v16, %v330_v14 }
 0x273   :  { %v251_v56 = vpop.xlane.xlu1 %250 }
 0x274   :  { %v252_v58 = vrot.slane %v251_v56, 4 }
 0x276   :  { %v253_v59 = vadd.f32 %v252_v58, %v251_v56 }
 0x278   :  { %v254_v62 = vrot.slane %v253_v59, 2 }
 0x27a   :  { %v255_v63 = vadd.f32 %v254_v62, %v253_v59 }
 0x27b   :  { %v313_v3 = vpop.xlane.xlu1 %312 }
 0x27c   :  { %v314_v22 = vrot.slane %v313_v3, 4  ;;  %v256_v8 = vrot.slane %v255_v63, 1 }
 0x27e   :  { %v315_v11 = vadd.f32 %v314_v22, %v313_v3  ;;  %v257_v12 = vadd.f32 %v256_v8, %v255_v63 }
 0x280   :  { %v316_v15 = vrot.slane %v315_v11, 2  ;;  %356 = vpush %v257_v12 }
 0x281   :  { %358 = vpush %v279_v4 }
 0x282   :  { %v317_v1 = vadd.f32 %v316_v15, %v315_v11  ;;  %360 = vpush %v291_v0 }
 0x284   :  { %v318_v17 = vrot.slane %v317_v1, 1 }
 0x286   :  { %v319_v5 = vadd.f32 %v318_v17, %v317_v1 }
 0x288   :  { %362 = vpush %v319_v5 }
 0x289   :  { %364 = vpush %v332_v18 }
 0x2b1   :  { %s357_s10 = spop %356 }
 0x2b2   :  { %s259_s11 = sadd.f32 %s357_s10, %s355_s9  ;;  %s359_s12 = spop %358 }
 0x2b3   :  { %s361_s14 = spop %360 }
 0x2b4   :  { %s281_s13 = sadd.f32 %s359_s12, %s259_s11 }
 0x2b6   :  { %336 = sst [smem:[#allocation2]] %s281_s13 }
 0x2b9   :  { %s363_s15 = spop %362 }
 0x2ba   :  { %s321_s19 = sadd.f32 %s363_s15, %s361_s14  ;;  %s365_s0 = spop %364 }
 0x2bc   :  { %s334_s20 = sadd.f32 %s365_s0, %s321_s19 }
 0x2be   :  { %338 = sst [smem:[#allocation2 + $0x1]] %s334_s20 }
 0x2bf   :  { %347 = dma.smem_to_hbm %s407_s21, 16, %s345_s18, [#allocation3]  }
 0x2c0   :  { %398 = dma.done.wait [#allocation3], 16  }
 0x2c1   :  { %399 = vsyncadd [#allocation3], 4294967280 }
 0x2c2   :  { %352 = sfence }
 0x2c3   :  { %353 = vsyncpa [#allocation3], 1 }

</bundles_post_ra>
